<compile_context>
chip_gen: v6e
topology: v6e:2x2x1
jax: 0.10.0
libtpu: 0.0.40
codegen_flags: <defaults>
</compile_context>

<pallas_src>
import numpy as np
import jax
import jax.numpy as jnp
from jax.experimental import pallas as pl
from jax.experimental.pallas import tpu as pltpu


def _pe_add_kernel(enc_ref, x_ref, o_ref):
    """Pure residual add.  enc_ref: (1, tL), x_ref/o_ref: (tB, tL)."""
    o_ref[...] = x_ref[...] + enc_ref[...]


def make_positional_terms(dim_model, max_wavelength=10000.0):
    """Deterministic buffer construction mirroring PositionalEncoder.__init__."""
    n_sin = int(dim_model / 2)
    n_cos = dim_model - n_sin
    scale = max_wavelength / (2.0 * np.pi)
    # NOTE: inherits the reference's (n_sin - 1) divisor; dim_model <= 2 would divide by zero,
    # exactly as in the PyTorch module.
    sin_term = scale ** (np.arange(0, n_sin, dtype=np.float32) / (n_sin - 1))
    cos_term = scale ** (np.arange(0, n_cos, dtype=np.float32) / (n_cos - 1))
    return jnp.asarray(sin_term, jnp.float32), jnp.asarray(cos_term, jnp.float32)


def _make_encoding(n_seq, sin_term, cos_term, dtype):
    """Precompute the (n_seq, F) sinusoidal table once (plain XLA, outside the kernel)."""
    pos = jnp.arange(n_seq, dtype=jnp.float32)[:, None]
    sin_pos = jnp.sin(pos / sin_term[None, :])
    cos_pos = jnp.cos(pos / cos_term[None, :])
    return jnp.concatenate([sin_pos, cos_pos], axis=1).astype(dtype)


def _pick_tile(total, base, cap):
    """Largest multiple of `base` that divides `total` and is <= cap; else full extent.

    Full extent is always legal w.r.t. the (8, 128) block constraint.
    """
    if total % base != 0:
        return total
    best = base
    t = 2 * base
    limit = min(total, cap)
    while t <= limit:
        if total % t == 0:
            best = t
        t += base
    return min(best, total)


def positional_encoder(x, sin_term, cos_term):
    """x: (B, N, F) with F == len(sin_term) + len(cos_term). Returns (B, N, F)."""
    B, N, F = x.shape
    n_sin = sin_term.shape[0]
    n_cos = cos_term.shape[0]
    assert n_sin + n_cos == F

    # Precompute the encoding table once and pre-cast to the activation dtype so the kernel
    # does no per-step transcendentals, divides, concatenations, or dtype conversions.
    enc = _make_encoding(N, sin_term, cos_term, x.dtype)          # (N, F)

    # Flatten to a lane-dense 2D layout: the per-row encoding is the same for every batch row.
    L = N * F
    x2 = x.reshape(B, L)
    enc2 = enc.reshape(1, L)

    itemsize = jnp.dtype(x.dtype).itemsize
    tL = _pick_tile(L, 128, 16384)                                # lane tile (multiple of 128)
    max_rows = max(8, (4 * 1024 * 1024) // max(1, tL * itemsize)) # keep blocks <= ~4 MiB
    tB = _pick_tile(B, 8, max_rows)                               # sublane tile (multiple of 8)

    grid = (B // tB, L // tL)

    out2 = pl.pallas_call(
        _pe_add_kernel,
        out_shape=jax.ShapeDtypeStruct((B, L), x.dtype),
        grid_spec=pltpu.PrefetchScalarGridSpec(
            num_scalar_prefetch=0,
            grid=grid,
            in_specs=[
                pl.BlockSpec((1, tL), lambda i, j: (0, j)),       # enc: VMEM-resident per lane-tile
                pl.BlockSpec((tB, tL), lambda i, j: (i, j)),      # x
            ],
            out_specs=pl.BlockSpec((tB, tL), lambda i, j: (i, j)),
        ),
        compiler_params=pltpu.CompilerParams(
            dimension_semantics=("parallel", "parallel"),
            vmem_limit_bytes=32 * 1024 * 1024,
        ),
    )(enc2, x2)

    return out2.reshape(B, N, F)


def _reference(x, sin_term, cos_term):
    """Pure-JAX reference of the PyTorch forward."""
    B, N, F = x.shape
    pos = jnp.arange(N, dtype=jnp.float32)
    sin_in = jnp.broadcast_to(pos[None, :, None], (B, N, sin_term.shape[0]))
    cos_in = jnp.broadcast_to(pos[None, :, None], (B, N, cos_term.shape[0]))
    sin_pos = jnp.sin(sin_in / sin_term)
    cos_pos = jnp.cos(cos_in / cos_term)
    return jnp.concatenate([sin_pos, cos_pos], axis=2) + x


if __name__ == "__main__":
    batch, n_seq, dim_model = 2, 8, 32
    key = jax.random.PRNGKey(0)
    x = jax.random.normal(key, (batch, n_seq, dim_model), dtype=jnp.float32)

    sin_term, cos_term = make_positional_terms(dim_model)

    out = positional_encoder(x, sin_term, cos_term)
    out = jax.block_until_ready(out)

    ref = _reference(x, sin_term, cos_term)
    np.testing.assert_allclose(np.asarray(out), np.asarray(ref), rtol=1e-5, atol=1e-5)

    print("KERNEL_OK")
</pallas_src>

<mosaic_0001>
module attributes {stable_mosaic.version = 11 : i64} {
  func.func @_pe_add_kernel(%arg0: i32, %arg1: i32, %arg2: memref<1x256xf32, #tpu.memory_space<vmem>>, %arg3: memref<2x256xf32, #tpu.memory_space<vmem>>, %arg4: memref<2x256xf32, #tpu.memory_space<vmem>>) attributes {dimension_semantics = [#tpu.dimension_semantics<parallel>, #tpu.dimension_semantics<parallel>], iteration_bounds = array<i64: 1, 1>, scalar_prefetch = 0 : i64, scratch_operands = 0 : i64, tpu.core_type = #tpu.core_type<tc>, window_params = [{transform_indices = @transform_0, window_bounds = array<i64: 1, 256>}, {transform_indices = @transform_1, window_bounds = array<i64: 2, 256>}, {transform_indices = @transform_2, window_bounds = array<i64: 2, 256>}]} {
    %c0 = arith.constant 0 : index
    %c0_0 = arith.constant 0 : index
    %0 = vector.load %arg3[%c0, %c0_0] : memref<2x256xf32, #tpu.memory_space<vmem>>, vector<2x256xf32>
    %c0_1 = arith.constant 0 : index
    %c0_2 = arith.constant 0 : index
    %1 = vector.load %arg2[%c0_1, %c0_2] : memref<1x256xf32, #tpu.memory_space<vmem>>, vector<1x256xf32>
    %2 = vector.broadcast %1 : vector<1x256xf32> to vector<2x256xf32>
    %3 = arith.addf %0, %2 : vector<2x256xf32>
    %c0_3 = arith.constant 0 : index
    %c0_4 = arith.constant 0 : index
    %4 = vector.load %arg4[%c0_3, %c0_4] : memref<2x256xf32, #tpu.memory_space<vmem>>, vector<2x256xf32>
    tpu.vector_store %arg4[%c0_3, %c0_4], %3 {strides = array<i32>} : memref<2x256xf32, #tpu.memory_space<vmem>>, vector<2x256xf32>,
    return
  }
  func.func @transform_0(%arg0: i32, %arg1: i32) -> (i32, i32) {
    %c0_i32 = arith.constant 0 : i32
    %c0_i32_0 = arith.constant 0 : i32
    return %c0_i32, %arg1 : i32, i32
  }
  func.func @transform_1(%arg0: i32, %arg1: i32) -> (i32, i32) {
    %c0_i32 = arith.constant 0 : i32
    return %arg0, %arg1 : i32, i32
  }
  func.func @transform_2(%arg0: i32, %arg1: i32) -> (i32, i32) {
    %c0_i32 = arith.constant 0 : i32
    return %arg0, %arg1 : i32, i32
  }
}

</mosaic_0001>

<bundles_post_ra>
// kernel: tpu_custom_call.1
= control target key start
LH: loop header
LB: loop body
LE: loop exit
PB: predicated region body
PF: predicated region fallthrough
CT: control target
= control target key end

     0   :  { %7 = vsyncpa [#allocation3], 0  ;;  %s172_s0 = inlined_call_operand.hbm [shape: f32[1,256], index: 0, kind: input, shape index: {}]   ;;  %s173_s1 = inlined_call_operand.hbm [shape: f32[2,256], index: 1, kind: input, shape index: {}]   ;;  %s174_s2 = inlined_call_operand.hbm [shape: f32[2,256], index: 2, kind: output, shape index: {}]  }
   0x1   :  { %8 = vsyncpa [#allocation6], 0 }
   0x2   :  { %9 = vsyncpa [#allocation4], 0  ;;  %s144_s9 = smov [#allocation2]   ;;  %s145_s11 = smov [#allocation5]  }
   0x3   :  { %s16_s10 = sshll.u32 %s144_s9, 4  ;;  %s26_s12 = sshll.u32 %s145_s11, 4  ;;  %s17_s10 = int_to_ptr.vmem [resolvable:$true] %s16_s10  ;;  %s27_s12 = int_to_ptr.vmem [resolvable:$true] %s26_s12 }
   0x4   :  { %s86_s13 = scalar_lea.vmem %s17_s10, 32  ;;  %p91_p1 = scmp.lt.s32.totalorder %s17_s10, %s17_s10 }
   0x5   :  { %p87_p0 = scmp.ne.s32.totalorder %s17_s10, %s86_s13  ;;  %p92_p2 = scmp.lt.s32.totalorder %s86_s13, %s86_s13 }
   0x7   :  { %p93_p3 = por %p92_p2, %p91_p1 }
   0x9   :  { %p94_p4 = pnand %p93_p3, %p87_p0 }
   0xb   :  { %97 = shalt.err (!%p94_p4)
}
   0xc   :  { %19 = dma.hbm_to_vmem [thread:$0]  %s172_s0, 32, %s17_s10, [#allocation3]  }
   0xd   :  { %s106_s16 = scalar_lea.vmem %s27_s12, 64  ;;  %p111_p6 = scmp.lt.s32.totalorder %s27_s12, %s27_s12 }
   0xe   :  { %p107_p5 = scmp.ne.s32.totalorder %s27_s12, %s106_s16  ;;  %p112_p7 = scmp.lt.s32.totalorder %s106_s16, %s106_s16 }
  0x10   :  { %p113_p8 = por %p112_p7, %p111_p6 }
  0x12   :  { %p114_p9 = pnand %p113_p8, %p107_p5 }
  0x14   :  { %117 = shalt.err (!%p114_p9)
}
  0x15   :  { %29 = dma.hbm_to_vmem [thread:$0]  %s173_s1, 64, %s27_s12, [#allocation6]  }
  0x16   :  { %138 = dma.done.wait [#allocation3], 32  }
  0x17   :  { %139 = vsyncadd [#allocation3], 4294967264 }
  0x18   :  { %140 = dma.done.wait [#allocation6], 64  }
  0x19   :  { %141 = vsyncadd [#allocation6], 4294967232  ;;  %v39_v0 = vlaneseq  ;;  %v146_v1 = vmov 1983009808   ;;  %v37_v7 = vld [vmem:[#allocation2] sm:$0x3] }
  0x1a   :  { %v49_v2 = vunpack.c.l.s4 %v146_v1  ;;  %v36_v12 = vld [vmem:[#allocation5] sm:$0xf]  ;;  %s147_s0 = smov [#allocation7]  }
  0x1b   :  { %v40_v3 = vshrl.u32 %v39_v0, 7  ;;  %s64_s19 = sshll.u32 %s147_s0, 4  ;;  %s65_s19 = int_to_ptr.vmem [resolvable:$true] %s64_s19 }
  0x1c   :  { %v50_v6 = vunpack.c.0.s8 %v49_v2  ;;  %s118_s1 = scalar_lea.vmem %s65_s19, 64  ;;  %p123_p11 = scmp.lt.s32.totalorder %s65_s19, %s65_s19 }
  0x1d   :  { %v41_v4 = vsub.s32 0, %v40_v3  ;;  %v45_v5 = vsub.s32 1, %v40_v3  ;;  %p119_p10 = scmp.ne.s32.totalorder %s65_s19, %s118_s1  ;;  %p124_p12 = scmp.lt.s32.totalorder %s118_s1, %s118_s1 }
  0x1e   :  { %v53_v10 = vsub.s32 %v50_v6, %v40_v3 }
  0x1f   :  { %v42_v8 = vrot.slane %v37_v7, %v41_v4  ;;  %v46_v9 = vrot.slane %v37_v7, %v45_v5  ;;  %p125_p13 = por %p124_p12, %p123_p11 }
  0x21   :  { %v47_v11 = vcombine.low %v42_v8, %v46_v9  ;;  %p126_p0 = pnand %p125_p13, %p119_p10 }
  0x23   :  { %v54_v13 = vrot.slane %v47_v11, %v53_v10 }
  0x25   :  { %v56_v14 = vadd.f32 %v54_v13, %v36_v12 }
  0x27   :  { %57 = vst [vmem:[#allocation7] sm:$0xf] %v56_v14 }
  0x28   :  { %129 = shalt.err (!%p126_p0)
}
  0x29   :  { %67 = dma.vmem_to_hbm [thread:$0]  %s65_s19, 64, %s174_s2, [#allocation4]  }
  0x2a   :  { %142 = dma.done.wait [#allocation4], 64  }
  0x2b   :  { %143 = vsyncadd [#allocation4], 4294967232 }
  0x2c   :  { %71 = vsyncpa [#allocation3], 1 }
  0x2d   :  { %72 = vsyncpa [#allocation6], 1 }
  0x2e   :  { %73 = vsyncpa [#allocation4], 1 }

</bundles_post_ra>
